<compile_context>
chip_gen: v7x
topology: tpu7x:2x2x1
jax: 0.10.0
libtpu: 0.0.40
codegen_flags: <defaults>
</compile_context>

<pallas_src>
import functools

import jax
import jax.numpy as jnp
from jax.experimental import pallas as pl
from jax.experimental.pallas import tpu as pltpu


_VMEM_BUDGET = 8 * 1024 * 1024  # bytes for both input blocks, double-buffered


def _gradient_loss_kernel(gen_ref, gt_ref, out_ref, carry_ref, *, alpha, img_w):
    h = pl.program_id(1)

    gen = gen_ref[0].astype(jnp.float32)        # (C, tH, Wp)
    gt = gt_ref[0].astype(jnp.float32)

    # conv with the [-1, 1] filters sums over channels and is linear, so
    # gt_dx - gen_dx == dx(sum_c(gt - gen)); same for dy.
    e = jnp.sum(gt - gen, axis=0)               # (tH, Wp)
    tH, Wp = e.shape

    lane = jax.lax.broadcasted_iota(jnp.int32, (tH, Wp), 1)
    row = jax.lax.broadcasted_iota(jnp.int32, (tH, Wp), 0)

    # Horizontal difference: "previous column", zeroed at every packed image's
    # first column (matches F.pad(x, (1, 0, 0, 0))).
    prev_w = pltpu.roll(e, shift=1, axis=1)
    prev_w = jnp.where(lane % img_w == 0, 0.0, prev_w)
    diff_x = e - prev_w

    # Vertical difference: "previous row"; row 0 of this H tile uses the
    # carried last row of the previous H tile (zero for the first tile,
    # matching F.pad(x, (0, 0, 1, 0))).
    top = jnp.where(h == 0, jnp.zeros_like(carry_ref[...]), carry_ref[...])
    prev_h = pltpu.roll(e, shift=1, axis=0)
    prev_h = jnp.where(row == 0, top, prev_h)
    diff_y = e - prev_h

    if alpha == 2:
        terms = diff_x * diff_x + diff_y * diff_y       # |d|**2 == d*d
    else:
        terms = jnp.abs(diff_x) ** alpha + jnp.abs(diff_y) ** alpha

    # Lane-vector partial sum; the cross-lane reduction is done in the wrapper.
    out_ref[...] = jnp.sum(terms, axis=0)[None, None, None, :]

    # Carry this tile's last row for the next H tile of the same batch block.
    carry_ref[...] = e[tH - 1:, :]


def _choose_packing(N, C, H, W, itemsize, budget):
    """Pick (#images packed along the lane axis, H tile size)."""
    if W >= 128:
        bn = 1                                   # already lane-dense
    else:
        max_by_lanes = max(1, 2048 // W)         # target ~2048-lane slabs
        per_img = 4 * C * H * W * itemsize       # 2 inputs x double-buffered
        max_by_vmem = max(1, budget // max(per_img, 1))
        bn = int(min(N, max_by_lanes, max_by_vmem))

    wp = bn * W
    if 4 * C * H * wp * itemsize <= budget or H <= 8:
        return bn, H
    th = H
    for t in range(8, H, 8):                     # largest mult-of-8 divisor that fits
        if H % t == 0 and 4 * C * t * wp * itemsize <= budget:
            th = t
    return bn, th


def gradient_loss(gen_frames, gt_frames, alpha=2, *, max_block_bytes=_VMEM_BUDGET):
    """Pallas equivalent of Gradient_Loss(alpha, channels)(gen, gt) -> scalar."""
    N, C, H, W = gen_frames.shape
    assert gt_frames.shape == gen_frames.shape

    itemsize = jnp.dtype(gen_frames.dtype).itemsize
    bn, th = _choose_packing(N, C, H, W, itemsize, max_block_bytes)

    n_pad = ((N + bn - 1) // bn) * bn
    if n_pad != N:
        pad = ((0, n_pad - N), (0, 0), (0, 0), (0, 0))
        # Zero-padded images contribute exactly 0 to the sum (gt == gen == 0).
        gen_frames = jnp.pad(gen_frames, pad)
        gt_frames = jnp.pad(gt_frames, pad)

    G = n_pad // bn
    Wp = bn * W
    nH = H // th

    def pack(x):
        # (n_pad, C, H, W) -> (G, C, H, bn*W): bn images side by side on lanes.
        x = x.reshape(G, bn, C, H, W)
        x = jnp.transpose(x, (0, 2, 3, 1, 4))
        return x.reshape(G, C, H, Wp)

    gen_p = pack(gen_frames)
    gt_p = pack(gt_frames)

    block_bytes = 4 * C * th * Wp * itemsize
    params = {"dimension_semantics": ("parallel", "arbitrary")}
    if block_bytes > max_block_bytes:
        # No clean multiple-of-8 H divisor fit; relax the scoped VMEM limit.
        # TODO(synk): a single huge H tile could still exceed v7x's 64 MiB
        # physical VMEM; that would need an uneven/halo H tiling path.
        params["vmem_limit_bytes"] = int(min(block_bytes + (8 << 20), 100 << 20))

    kernel = functools.partial(_gradient_loss_kernel, alpha=alpha, img_w=W)
    partials = pl.pallas_call(
        kernel,
        out_shape=jax.ShapeDtypeStruct((G, nH, 1, Wp), jnp.float32),
        grid_spec=pltpu.PrefetchScalarGridSpec(
            num_scalar_prefetch=0,
            grid=(G, nH),
            in_specs=[
                pl.BlockSpec((1, C, th, Wp), lambda g, h: (g, 0, h, 0)),
                pl.BlockSpec((1, C, th, Wp), lambda g, h: (g, 0, h, 0)),
            ],
            out_specs=pl.BlockSpec((1, 1, 1, Wp), lambda g, h: (g, h, 0, 0)),
            scratch_shapes=[pltpu.VMEM((1, Wp), jnp.float32)],
        ),
        compiler_params=pltpu.CompilerParams(**params),
    )(gen_p, gt_p)

    # torch.mean over the (N, 1, H, W) conv-diff maps; padded images add 0.
    return (jnp.sum(partials) / (N * H * W)).astype(jnp.float32)


def _reference(gen, gt, alpha):
    """Pure-JAX replica of the PyTorch forward for verification."""
    def dgrad(x):
        xp = jnp.pad(x, ((0, 0), (0, 0), (0, 0), (1, 0)))
        dx = jnp.sum(xp[..., 1:] - xp[..., :-1], axis=1)       # sum over C
        yp = jnp.pad(x, ((0, 0), (0, 0), (1, 0), (0, 0)))
        dy = jnp.sum(yp[:, :, 1:, :] - yp[:, :, :-1, :], axis=1)
        return dx, dy

    gen_dx, gen_dy = dgrad(gen)
    gt_dx, gt_dy = dgrad(gt)
    return jnp.mean(jnp.abs(gt_dx - gen_dx) ** alpha
                    + jnp.abs(gt_dy - gen_dy) ** alpha)


if __name__ == "__main__":
    key = jax.random.PRNGKey(0)
    k1, k2, k3, k4, k5, k6 = jax.random.split(key, 6)

    # Primary test: module-like shapes (lane-packed, single H tile, alpha=2).
    N, C, H, W = 2, 4, 16, 16
    gen = jax.random.normal(k1, (N, C, H, W), dtype=jnp.float32)
    gt = jax.random.normal(k2, (N, C, H, W), dtype=jnp.float32)
    out = jax.block_until_ready(gradient_loss(gen, gt, alpha=2))
    ref = _reference(gen, gt, 2)
    assert jnp.allclose(out, ref, rtol=1e-5, atol=1e-5), (out, ref)

    # Secondary test: odd batch (lane packing + zero-pad) and alpha != 2.
    gen2 = jax.random.normal(k3, (3, 2, 16, 24), dtype=jnp.float32)
    gt2 = jax.random.normal(k4, (3, 2, 16, 24), dtype=jnp.float32)
    out2 = jax.block_until_ready(
        gradient_loss(gen2, gt2, alpha=3, max_block_bytes=25 * 1024))
    ref2 = _reference(gen2, gt2, 3)
    assert jnp.allclose(out2, ref2, rtol=1e-4, atol=1e-4), (out2, ref2)

    # Third test: forced H tiling to exercise the carried-row boundary path.
    gen3 = jax.random.normal(k5, (1, 2, 32, 24), dtype=jnp.float32)
    gt3 = jax.random.normal(k6, (1, 2, 32, 24), dtype=jnp.float32)
    out3 = jax.block_until_ready(
        gradient_loss(gen3, gt3, alpha=2, max_block_bytes=16 * 1024))
    ref3 = _reference(gen3, gt3, 2)
    assert jnp.allclose(out3, ref3, rtol=1e-5, atol=1e-5), (out3, ref3)

    print("KERNEL_OK")
</pallas_src>

<mosaic_0001>
module attributes {stable_mosaic.version = 11 : i64} {
  func.func @_gradient_loss_kernel(%arg0: i32, %arg1: i32, %arg2: memref<1x4x16x32xf32, #tpu.memory_space<vmem>>, %arg3: memref<1x4x16x32xf32, #tpu.memory_space<vmem>>, %arg4: memref<1x1x1x32xf32, #tpu.memory_space<vmem>>, %arg5: memref<1x32xf32, #tpu.memory_space<vmem>>) attributes {dimension_semantics = [#tpu.dimension_semantics<parallel>, #tpu.dimension_semantics<arbitrary>], iteration_bounds = array<i64: 1, 1>, scalar_prefetch = 0 : i64, scratch_operands = 1 : i64, tpu.core_type = #tpu.core_type<tc>, window_params = [{transform_indices = @transform_0, window_bounds = array<i64: 1, 4, 16, 32>}, {transform_indices = @transform_1, window_bounds = array<i64: 1, 4, 16, 32>}, {transform_indices = @transform_2, window_bounds = array<i64: 1, 1, 1, 32>}]} {
    %c0 = arith.constant 0 : index
    %c0_0 = arith.constant 0 : index
    %c0_1 = arith.constant 0 : index
    %c0_2 = arith.constant 0 : index
    %0 = vector.load %arg2[%c0, %c0_0, %c0_1, %c0_2] : memref<1x4x16x32xf32, #tpu.memory_space<vmem>>, vector<1x4x16x32xf32>
    %1 = vector.shape_cast %0 : vector<1x4x16x32xf32> to vector<4x16x32xf32>
    %c0_3 = arith.constant 0 : index
    %c0_4 = arith.constant 0 : index
    %c0_5 = arith.constant 0 : index
    %c0_6 = arith.constant 0 : index
    %2 = vector.load %arg3[%c0_3, %c0_4, %c0_5, %c0_6] : memref<1x4x16x32xf32, #tpu.memory_space<vmem>>, vector<1x4x16x32xf32>
    %3 = vector.shape_cast %2 : vector<1x4x16x32xf32> to vector<4x16x32xf32>
    %4 = arith.subf %3, %1 : vector<4x16x32xf32>
    %cst = arith.constant dense<0.000000e+00> : vector<16x32xf32>
    %5 = vector.multi_reduction <add>, %4, %cst [0] : vector<4x16x32xf32> to vector<16x32xf32>
    %6 = tpu.iota {dimensions = array<i32: 1>} : vector<16x32xi32>
    %7 = tpu.iota {dimensions = array<i32: 0>} : vector<16x32xi32>
    %c1_i32 = arith.constant 1 : i32
    %8 = tpu.dynamic_rotate %5 by %c1_i32 dim 1 : vector<16x32xf32>, i32 -> vector<16x32xf32>
    %c16_i32 = arith.constant 16 : i32
    %c0_i32 = arith.constant 0 : i32
    %9 = arith.cmpi eq, %c16_i32, %c0_i32 : i32
    %c1_i32_7 = arith.constant 1 : i32
    %10 = arith.select %9, %c1_i32_7, %c16_i32 : i32
    %11 = vector.broadcast %10 : i32 to vector<16x32xi32>
    %12 = arith.remsi %6, %11 : vector<16x32xi32>
    %c0_i32_8 = arith.constant 0 : i32
    %13 = vector.broadcast %c0_i32_8 : i32 to vector<16x32xi32>
    %14 = arith.cmpi ne, %12, %13 : vector<16x32xi32>
    %c0_i32_9 = arith.constant 0 : i32
    %15 = vector.broadcast %c0_i32_9 : i32 to vector<16x32xi32>
    %16 = arith.cmpi slt, %12, %15 : vector<16x32xi32>
    %c0_i32_10 = arith.constant 0 : i32
    %17 = arith.cmpi slt, %10, %c0_i32_10 : i32
    %18 = vector.broadcast %17 : i1 to vector<16x32xi1>
    %19 = vector.broadcast %18 : vector<16x32xi1> to vector<16x32xi1>
    %20 = arith.xori %16, %19 : vector<16x32xi1>
    %21 = arith.andi %20, %14 : vector<16x32xi1>
    %22 = vector.broadcast %10 : i32 to vector<16x32xi32>
    %23 = arith.addi %12, %22 : vector<16x32xi32>
    %24 = arith.select %21, %23, %12 : vector<16x32xi1>, vector<16x32xi32>
    %c0_i32_11 = arith.constant 0 : i32
    %25 = vector.broadcast %c0_i32_11 : i32 to vector<16x32xi32>
    %26 = arith.cmpi eq, %24, %25 : vector<16x32xi32>
    %cst_12 = arith.constant 0.000000e+00 : f32
    %27 = vector.broadcast %cst_12 : f32 to vector<16x32xf32>
    %28 = arith.select %26, %27, %8 : vector<16x32xi1>, vector<16x32xf32>
    %29 = arith.subf %5, %28 : vector<16x32xf32>
    %c0_i32_13 = arith.constant 0 : i32
    %30 = arith.cmpi eq, %arg1, %c0_i32_13 : i32
    %cst_14 = arith.constant 0.000000e+00 : f32
    %31 = vector.broadcast %cst_14 : f32 to vector<1x32xf32>
    %c0_15 = arith.constant 0 : index
    %c0_16 = arith.constant 0 : index
    %32 = vector.load %arg5[%c0_15, %c0_16] : memref<1x32xf32, #tpu.memory_space<vmem>>, vector<1x32xf32>
    %33 = arith.select %30, %31, %32 : vector<1x32xf32>
    %c1_i32_17 = arith.constant 1 : i32
    %34 = tpu.dynamic_rotate %5 by %c1_i32_17 dim 0 : vector<16x32xf32>, i32 -> vector<16x32xf32>
    %c0_i32_18 = arith.constant 0 : i32
    %35 = vector.broadcast %c0_i32_18 : i32 to vector<16x32xi32>
    %36 = arith.cmpi eq, %7, %35 : vector<16x32xi32>
    %37 = vector.shape_cast %33 : vector<1x32xf32> to vector<1x32xf32>
    %38 = vector.broadcast %37 : vector<1x32xf32> to vector<16x32xf32>
    %39 = arith.select %36, %38, %34 : vector<16x32xi1>, vector<16x32xf32>
    %40 = arith.subf %5, %39 : vector<16x32xf32>
    %41 = arith.mulf %29, %29 : vector<16x32xf32>
    %42 = arith.mulf %40, %40 : vector<16x32xf32>
    %43 = arith.addf %41, %42 : vector<16x32xf32>
    %cst_19 = arith.constant dense<0.000000e+00> : vector<32xf32>
    %44 = vector.multi_reduction <add>, %43, %cst_19 [0] : vector<16x32xf32> to vector<32xf32>
    %45 = vector.shape_cast %44 : vector<32xf32> to vector<1x1x1x32xf32>
    %c0_20 = arith.constant 0 : index
    %c0_21 = arith.constant 0 : index
    %c0_22 = arith.constant 0 : index
    %c0_23 = arith.constant 0 : index
    %46 = vector.load %arg4[%c0_20, %c0_21, %c0_22, %c0_23] : memref<1x1x1x32xf32, #tpu.memory_space<vmem>>, vector<1x1x1x32xf32>
    tpu.vector_store %arg4[%c0_20, %c0_21, %c0_22, %c0_23], %45 {strides = array<i32>} : memref<1x1x1x32xf32, #tpu.memory_space<vmem>>, vector<1x1x1x32xf32>,
    %47 = vector.extract_strided_slice %5 {offsets = [15, 0], sizes = [1, 32], strides = [1, 1]} : vector<16x32xf32> to vector<1x32xf32>
    %c0_24 = arith.constant 0 : index
    %c0_25 = arith.constant 0 : index
    %48 = vector.load %arg5[%c0_24, %c0_25] : memref<1x32xf32, #tpu.memory_space<vmem>>, vector<1x32xf32>
    tpu.vector_store %arg5[%c0_24, %c0_25], %47 {strides = array<i32>} : memref<1x32xf32, #tpu.memory_space<vmem>>, vector<1x32xf32>,
    return
  }
  func.func @transform_0(%arg0: i32, %arg1: i32) -> (i32, i32, i32, i32) {
    %c0_i32 = arith.constant 0 : i32
    %c0_i32_0 = arith.constant 0 : i32
    %c0_i32_1 = arith.constant 0 : i32
    return %arg0, %c0_i32, %arg1, %c0_i32_0 : i32, i32, i32, i32
  }
  func.func @transform_1(%arg0: i32, %arg1: i32) -> (i32, i32, i32, i32) {
    %c0_i32 = arith.constant 0 : i32
    %c0_i32_0 = arith.constant 0 : i32
    %c0_i32_1 = arith.constant 0 : i32
    return %arg0, %c0_i32, %arg1, %c0_i32_0 : i32, i32, i32, i32
  }
  func.func @transform_2(%arg0: i32, %arg1: i32) -> (i32, i32, i32, i32) {
    %c0_i32 = arith.constant 0 : i32
    %c0_i32_0 = arith.constant 0 : i32
    %c0_i32_1 = arith.constant 0 : i32
    return %arg0, %arg1, %c0_i32, %c0_i32_0 : i32, i32, i32, i32
  }
}

</mosaic_0001>

<bundles_post_ra>
// kernel: tpu_custom_call.1
= control target key start
LH: loop header
LB: loop body
LE: loop exit
PB: predicated region body
PF: predicated region fallthrough
CT: control target
= control target key end

     0   :  { %7 = vsyncpa [#allocation4], 0  ;;  %s329_s0 = inlined_call_operand.hbm [shape: f32[1,4,16,32], index: 0, kind: input, shape index: {}]   ;;  %s330_s1 = inlined_call_operand.hbm [shape: f32[1,4,16,32], index: 1, kind: input, shape index: {}]   ;;  %s331_s2 = inlined_call_operand.hbm [shape: f32[1,1,1,32], index: 2, kind: output, shape index: {}]  }
   0x1   :  { %8 = vsyncpa [#allocation7], 0 }
   0x2   :  { %9 = vsyncpa [#allocation5], 0  ;;  %s260_s9 = smov [#allocation3]   ;;  %s188_s13 = scalar_lea.hbm %s329_s0, 1024 }
   0x3   :  { %s15_s10 = sshll.u32 %s260_s9, 4  ;;  %p189_p0 = scmp.ne.s32.totalorder %s329_s0, %s188_s13  ;;  %s16_s10 = int_to_ptr.vmem [resolvable:$true] %s15_s10 }
   0x4   :  { %p192_p1 = scmp.lt.u32.totalorder %s188_s13, %s329_s0 }
   0x6   :  { %p194_p2 = pnand %p192_p1, %p189_p0 }
   0x8   :  { %197 = shalt.err (!%p194_p2)
}
   0x9   :  { %s198_s18 = scalar_lea.vmem %s16_s10, 1024  ;;  %p203_p4 = scmp.lt.s32.totalorder %s16_s10, %s16_s10 }
   0xa   :  { %p199_p3 = scmp.ne.s32.totalorder %s16_s10, %s198_s18  ;;  %p204_p5 = scmp.lt.s32.totalorder %s198_s18, %s198_s18 }
   0xc   :  { %p205_p6 = por %p204_p5, %p203_p4 }
   0xe   :  { %p206_p7 = pnand %p205_p6, %p199_p3 }
  0x10   :  { %209 = shalt.err (!%p206_p7)
}
  0x11   :  { %s261_s19 = smov 128   ;;  %s262_s20 = smov 8  }
  0x12   :  { %21 = dma.hbm_to_vmem [thread:$0]  %s329_s0, 1024, %s16_s10, [#allocation4], %s261_s19, %s261_s19, %s262_s20  }
  0x13   :  { %s263_s23 = smov [#allocation6]   ;;  %s210_s27 = scalar_lea.hbm %s330_s1, 1024 }
  0x14   :  { %s27_s24 = sshll.u32 %s263_s23, 4  ;;  %p211_p8 = scmp.ne.s32.totalorder %s330_s1, %s210_s27  ;;  %s28_s24 = int_to_ptr.vmem [resolvable:$true] %s27_s24 }
  0x15   :  { %p214_p9 = scmp.lt.u32.totalorder %s210_s27, %s330_s1 }
  0x17   :  { %p216_p10 = pnand %p214_p9, %p211_p8 }
  0x19   :  { %219 = shalt.err (!%p216_p10)
}
  0x1a   :  { %s220_s4 = scalar_lea.vmem %s28_s24, 1024  ;;  %p225_p12 = scmp.lt.s32.totalorder %s28_s24, %s28_s24 }
  0x1b   :  { %p221_p11 = scmp.ne.s32.totalorder %s28_s24, %s220_s4  ;;  %p226_p13 = scmp.lt.s32.totalorder %s220_s4, %s220_s4 }
  0x1d   :  { %p227_p0 = por %p226_p13, %p225_p12 }
  0x1f   :  { %p228_p1 = pnand %p227_p0, %p221_p11 }
  0x21   :  { %231 = shalt.err (!%p228_p1)
}
  0x22   :  { %33 = dma.hbm_to_vmem [thread:$0]  %s330_s1, 1024, %s28_s24, [#allocation7], %s261_s19, %s261_s19, %s262_s20  }
  0x23   :  { %254 = dma.done.wait [#allocation4], 1024  }
  0x24   :  { %255 = vsyncadd [#allocation4], 4294966272 }
  0x25   :  { %256 = dma.done.wait [#allocation7], 1024  }
  0x26   :  { %257 = vsyncadd [#allocation7], 4294966272  ;;  %v40_v0 = vld [vmem:[#allocation3] sm:$0xff]  ;;  %v42_v1 = vld [vmem:[#allocation3 + $0x10] sm:$0xff]  ;;  %vm64_vm0 = vcmask 261120   ;;  %s264_s1 = smov 32   ;;  %v79_v46 = vlaneseq }
  0x27   :  { %v44_v2 = vld [vmem:[#allocation3 + $0x20] sm:$0xff]  ;;  %v46_v3 = vld [vmem:[#allocation3 + $0x30] sm:$0xff]  ;;  %v41_v10 = vld [vmem:[#allocation3 + $0x8] sm:$0xff]  ;;  %vm84_vm1 = vcmask 1047808   ;;  %s265_s6 = smov 97   ;;  %v266_v52 = vmov 0.0  }
  0x28   :  { %v48_v4 = vld [vmem:[#allocation6] sm:$0xff]  ;;  %v50_v5 = vld [vmem:[#allocation6 + $0x10] sm:$0xff]  ;;  %v43_v13 = vld [vmem:[#allocation3 + $0x18] sm:$0xff]  ;;  %v82_v47 = vshrl.u32 %v79_v46, 7  ;;  %v80_v49 = vand.u32 127, %v79_v46  ;;  %s267_s7 = smov [#allocation8]  }
  0x29   :  { %v52_v6 = vld [vmem:[#allocation6 + $0x20] sm:$0xff]  ;;  %v54_v7 = vld [vmem:[#allocation6 + $0x30] sm:$0xff]  ;;  %v56_v8 = vsub.f32 %v48_v4, %v40_v0  ;;  %v58_v9 = vsub.f32 %v50_v5, %v42_v1  ;;  %v45_v14 = vld [vmem:[#allocation3 + $0x28] sm:$0xff]  ;;  %s170_s8 = sshll.u32 %s267_s7, 4  ;;  %vm160_vm5 = vcmask 253952   ;;  %s171_s8 = int_to_ptr.vmem [resolvable:$true] %s170_s8 }
  0x2a   :  { %v60_v11 = vsub.f32 %v52_v6, %v44_v2  ;;  %v62_v12 = vsub.f32 %v54_v7, %v46_v3  ;;  %v47_v15 = vld [vmem:[#allocation3 + $0x38] sm:$0xff]  ;;  %v49_v18 = vld [vmem:[#allocation6 + $0x8] sm:$0xff]  ;;  %v138_v48 = vsub.s32 0, %v82_v47  ;;  %vm130_vm2 = vcmp.lt.s32.totalorder %v82_v47, 1  ;;  %s232_s9 = scalar_lea.vmem %s171_s8, 16  ;;  %s236_s10 = scalar_lea.vmem %s171_s8, 32 }
  0x2b   :  { %v65_v16 = vsel %vm64_vm0, %v56_v8, 0.0  ;;  %v66_v17 = vsel %vm64_vm0, %v58_v9, 0.0  ;;  %v51_v19 = vld [vmem:[#allocation6 + $0x18] sm:$0xff]  ;;  %v53_v20 = vld [vmem:[#allocation6 + $0x28] sm:$0xff]  ;;  %v57_v24 = vsub.f32 %v49_v18, %v41_v10  ;;  %v101_v54 = vand.u32 15, %v80_v49  ;;  %p233_p2 = scmp.ne.s32.totalorder %s171_s8, %s232_s9  ;;  %p237_p3 = scmp.lt.s32.totalorder %s171_s8, %s171_s8 }
  0x2c   :  { %v67_v21 = vadd.f32 %v66_v17, %v65_v16  ;;  %v68_v22 = vsel %vm64_vm0, %v60_v11, 0.0  ;;  %v55_v23 = vld [vmem:[#allocation6 + $0x38] sm:$0xff]  ;;  %v70_v25 = vsel %vm64_vm0, %v62_v12, 0.0  ;;  %v59_v26 = vsub.f32 %v51_v19, %v43_v13  ;;  %p238_p4 = scmp.lt.s32.totalorder %s236_s10, %s232_s9 }
  0x2d   :  { %v61_v27 = vsub.f32 %v53_v20, %v45_v14  ;;  %v63_v28 = vsub.f32 %v55_v23, %v47_v15  ;;  %v72_v30 = vsel %vm64_vm0, %v57_v24, 0.0  ;;  %v139_v53 = vrot.slane %v266_v52, %v138_v48 }
  0x2e   :  { %v69_v29 = vadd.f32 %v68_v22, %v67_v21  ;;  %v73_v31 = vsel %vm64_vm0, %v59_v26, 0.0  ;;  %vm133_vm3 = vcmp.eq.s32.totalorder %v82_v47, 0  ;;  %vm109_vm4 = vcmp.eq.s32.totalorder %v101_v54, 0  ;;  %p239_p5 = por %p238_p4, %p237_p3 }
  0x2f   :  { %v75_v32 = vsel %vm64_vm0, %v61_v27, 0.0  ;;  %v74_v34 = vadd.f32 %v73_v31, %v72_v30  ;;  %v77_v35 = vsel %vm64_vm0, %v63_v28, 0.0 }
  0x30   :  { %v71_v33 = vadd.f32 %v70_v25, %v69_v29  ;;  %p240_p6 = pnand %p239_p5, %p233_p2 }
  0x31   :  { %v76_v36 = vadd.f32 %v75_v32, %v74_v34 }
  0x32   :  { %85 = vrot.lane.b32.xlu0 %v71_v33, %s264_s1  ;;  %v128_v51 = vrot.slane %v71_v33, 7 }
  0x33   :  { %v78_v37 = vadd.f32 %v77_v35, %v76_v36 }
  0x35   :  { %v129_v50 = vrot.slane %v78_v37, 7 }
  0x36   :  { %88 = vrot.lane.b32.xlu0 %v78_v37, %s264_s1 }
  0x37   :  { %v132_v55 = vsel %vm130_vm2, %v129_v50, %v128_v51  ;;  %v131_v57 = vsel %vm130_vm2, %v128_v51, %v129_v50 }
  0x38   :  { %v141_v56 = vsel %vm133_vm3, %v139_v53, %v132_v55  ;;  %v144_v62 = vsub.f32 %v78_v37, %v131_v57 }
  0x39   :  { %v143_v59 = vsub.f32 %v71_v33, %v141_v56 }
  0x3a   :  { %v148_v4 = vmul.f32 %v144_v62, %v144_v62 }
  0x3b   :  { %v147_v0 = vmul.f32 %v143_v59, %v143_v59 }
  0xa4   :  { %v86_v38 = vpop.permute.xlu0 %85 }
  0xa5   :  { %v87_v39 = vsel %vm84_vm1, %v86_v38, %v71_v33 }
  0xa6   :  { %91 = vrot.lane.b32.xlu1 %v87_v39, %s264_s1 }
  0xa8   :  { %v89_v40 = vpop.permute.xlu0 %88 }
  0xa9   :  { %v90_v41 = vsel %vm84_vm1, %v89_v40, %v78_v37 }
  0xaa   :  { %93 = vrot.lane.b32.xlu1 %v90_v41, %s264_s1 }
 0x118   :  { %v92_v42 = vpop.permute.xlu1 %91 }
 0x119   :  { %v95_v43 = vsel %vm84_vm1, %v92_v42, %v71_v33 }
 0x11a   :  { %112 = vrot.lane.b32.xlu0 %v95_v43, %s265_s6 }
 0x11c   :  { %v94_v44 = vpop.permute.xlu1 %93 }
 0x11d   :  { %v96_v45 = vsel %vm84_vm1, %v94_v44, %v78_v37 }
 0x11e   :  { %114 = vrot.lane.b32.xlu1 %v96_v45, %s265_s6 }
 0x18c   :  { %v113_v58 = vpop.permute.xlu0 %112 }
 0x18d   :  { %v118_v60 = vsel %vm109_vm4, 0.0, %v113_v58 }
 0x18e   :  { %v120_v61 = vsub.f32 %v71_v33, %v118_v60 }
 0x190   :  { %v145_v63 = vmul.f32 %v120_v61, %v120_v61  ;;  %v115_v1 = vpop.permute.xlu1 %114 }
 0x191   :  { %v119_v2 = vsel %vm109_vm4, 0.0, %v115_v1 }
 0x192   :  { %v121_v3 = vsub.f32 %v78_v37, %v119_v2  ;;  %v149_v5 = vadd.f32 %v147_v0, %v145_v63 }
 0x194   :  { %v146_v6 = vmul.f32 %v121_v3, %v121_v3  ;;  %v151_v8 = vsel %vm64_vm0, %v149_v5, 0.0 }
 0x196   :  { %v150_v7 = vadd.f32 %v148_v4, %v146_v6 }
 0x198   :  { %v152_v9 = vsel %vm64_vm0, %v150_v7, 0.0 }
 0x199   :  { %v153_v10 = vadd.f32 %v152_v9, %v151_v8 }
 0x19b   :  { %v154_v11 = vrot.slane %v153_v10, 4 }
 0x19d   :  { %v155_v12 = vadd.f32 %v154_v11, %v153_v10 }
 0x19f   :  { %v156_v13 = vrot.slane %v155_v12, 2 }
 0x1a1   :  { %v157_v14 = vadd.f32 %v156_v13, %v155_v12 }
 0x1a3   :  { %v158_v15 = vrot.slane %v157_v14, 1 }
 0x1a5   :  { %v159_v16 = vadd.f32 %v158_v15, %v157_v14 }
 0x1a7   :  { %161 = vst.msk [vmem:[#allocation8] sm:$0x1] %vm160_vm5, %v159_v16 }
 0x1a8   :  { %243 = shalt.err (!%p240_p6)
}
 0x1a9   :  { %s244_s13 = scalar_lea.hbm %s331_s2, 16 }
 0x1aa   :  { %p245_p7 = scmp.ne.s32.totalorder %s331_s2, %s244_s13  ;;  %p248_p8 = scmp.lt.u32.totalorder %s244_s13, %s331_s2 }
 0x1ac   :  { %p250_p9 = pnand %p248_p8, %p245_p7 }
 0x1ae   :  { %253 = shalt.err (!%p250_p9)
}
 0x1af   :  { %173 = dma.vmem_to_hbm [thread:$0]  %s171_s8, 16, %s331_s2, [#allocation5]  }
 0x1b0   :  { %258 = dma.done.wait [#allocation5], 16  }
 0x1b1   :  { %259 = vsyncadd [#allocation5], 4294967280 }
 0x1b2   :  { %177 = vsyncpa [#allocation4], 1 }
 0x1b3   :  { %178 = vsyncpa [#allocation7], 1 }
 0x1b4   :  { %179 = vsyncpa [#allocation5], 1 }

</bundles_post_ra>
